<compile_context>
chip_gen: v5e
topology: v5e:2x2
jax: 0.10.0
libtpu: 0.0.40
codegen_flags: <defaults>
</compile_context>

<pallas_src>
import jax
import jax.numpy as jnp
from jax.experimental import pallas as pl
from jax.experimental.pallas import tpu as pltpu

BN_EPS = 1e-5  # PyTorch nn.BatchNorm1d default


def _round_up(x, m):
    return ((x + m - 1) // m) * m


# --------------------------------------------------------------------------
# Kernel
# --------------------------------------------------------------------------
def _twonn_kernel(x_ref, w1_ref, bpack_ref, w2_ref, w3t_ref, b3_ref, o_ref):
    """One batch tile: x [TB, D] -> out [1, TB] (lane-dense). BN pre-folded."""
    x = x_ref[...]                       # [TB, D] f32
    b1 = bpack_ref[0:1, :]               # [1, H]  (static slice, no copy)
    b2 = bpack_ref[1:2, :]               # [1, H]

    # Layer 1: Linear(D -> H) (BN folded) + ReLU.  Dropout(p=0) -> no-op.
    h1 = jnp.dot(x, w1_ref[...], preferred_element_type=jnp.float32) + b1
    h1 = jnp.maximum(h1, 0.0)

    # Layer 2: Linear(H -> H) (BN folded) + ReLU.
    h2 = jnp.dot(h1, w2_ref[...], preferred_element_type=jnp.float32) + b2
    h2 = jnp.maximum(h2, 0.0)

    # Layer 3: Linear(H -> 1) as VPU multiply + lane reduction (avoids an N=1
    # MXU matmul and keeps the output lane-dense).  b3 is an SMEM scalar.
    out = jnp.sum(h2 * w3t_ref[...], axis=-1) + b3_ref[0]    # [TB]
    o_ref[...] = out.reshape(1, -1).astype(o_ref.dtype)      # [1, TB]


# --------------------------------------------------------------------------
# BatchNorm folding (eval mode, f32)
# --------------------------------------------------------------------------
def fold_batchnorm(params):
    s1 = params["g1"] * jax.lax.rsqrt(params["v1"] + BN_EPS)          # [1, H]
    w1f = params["w1"] * s1                                           # [D, H]
    b1f = (params["b1"] - params["m1"]) * s1 + params["be1"]          # [1, H]

    s2 = params["g2"] * jax.lax.rsqrt(params["v2"] + BN_EPS)
    w2f = params["w2"] * s2                                           # [H, H]
    b2f = (params["b2"] - params["m2"]) * s2 + params["be2"]          # [1, H]

    bpack = jnp.concatenate([b1f, b2f], axis=0)                       # [2, H]
    w3t = params["w3"].T                                              # [1, H]
    b3 = params["b3"].reshape(1)                                      # [1]
    return w1f, bpack, w2f, w3t, b3


# --------------------------------------------------------------------------
# VMEM accounting (padded footprints) and tile selection
# --------------------------------------------------------------------------
def _vmem_capacity_bytes():
    try:
        return int(pltpu.get_tpu_info().vmem_capacity_bytes)
    except Exception:
        return 64 << 20   # conservative fallback (v7x per-TensorCore VMEM)


def _padded_vmem_bytes(D, H):
    """Padded (8-sublane x 128-lane) VMEM footprints in f32 bytes."""
    Dl = _round_up(max(D, 1), 128)
    Hl = _round_up(max(H, 1), 128)
    # Resident weights: single-buffered via pl.Buffered(1).
    weight_bytes = 4 * (
        _round_up(D, 8) * Hl       # w1
        + 8 * Hl                   # bpack (2,H) -> (8,Hl)
        + _round_up(H, 8) * Hl     # w2
        + 8 * Hl                   # w3^T (1,H) -> (8,Hl)
    )
    # Streamed / per-row VMEM (x double-buffered, activations, padded output).
    per_row_bytes = 4 * (
        2 * Dl                     # x tile, 2 buffers
        + 3 * Hl                   # h1 / h2 / matmul temporaries
        + 2 * 8                    # (1,tb) output tile pads to 8 sublanes, 2 buffers
    )
    return weight_bytes, per_row_bytes


def _choose_batch_tile(B, D, H, vmem_cap, max_rows_per_step=None):
    weight_bytes, per_row = _padded_vmem_bytes(D, H)
    budget = max(vmem_cap - (8 << 20) - weight_bytes, 1 << 20)
    tb_vmem = budget // per_row
    # Each grid step should move >= ~2 MiB of x from HBM so the ~0.35 us
    # per-step pipeline overhead is amortized.
    tb_stream = max((2 << 20) // (D * 4), 1024)
    tb_cap = int(min(tb_vmem, tb_stream, 32768))
    if max_rows_per_step is not None:
        tb_cap = min(tb_cap, _round_up(max_rows_per_step, 128))
    tb_cap = max((tb_cap // 128) * 128, 128)

    nb = max(pl.cdiv(B, tb_cap), 1)
    # Keep >= 2 grid steps when there is real work so the "parallel" batch axis
    # can shard across both v7x TensorCores (no-op on single-core chips).
    if nb == 1 and B > 8192:
        nb = 2
    tb = _round_up(pl.cdiv(B, nb), 128)   # lane-dense output needs tb % 128 == 0
    return tb, nb


# --------------------------------------------------------------------------
# Forward wrapper
# --------------------------------------------------------------------------
def twonn_forward(x, params, *, max_rows_per_step=None):
    """x: [B, D] float32.  params: dict of f32 arrays (see init_params)."""
    B, D = x.shape
    H = params["w1"].shape[1]

    w1f, bpack, w2f, w3t, b3 = fold_batchnorm(params)

    vmem_cap = _vmem_capacity_bytes()
    tb, nb = _choose_batch_tile(B, D, H, vmem_cap, max_rows_per_step)
    b_pad = nb * tb
    if b_pad != B:
        x = jnp.pad(x, ((0, b_pad - B), (0, 0)))

    # Explicit, generation-clamped scoped VMEM limit (padded estimate + slack).
    weight_bytes, per_row = _padded_vmem_bytes(D, H)
    est_bytes = weight_bytes + per_row * tb + (2 << 20)
    vmem_limit = int(min(vmem_cap - (4 << 20),
                         max(int(est_bytes * 1.25), 32 << 20)))

    # TODO(synk): add an H-tiled (or bf16-weight) fallback if resident w1+w2
    # ever exceed the per-generation VMEM budget (w2 is H^2*4 bytes).
    def resident(shape):
        return pl.BlockSpec(shape, lambda i: (0, 0), pipeline_mode=pl.Buffered(1))

    out = pl.pallas_call(
        _twonn_kernel,
        out_shape=jax.ShapeDtypeStruct((1, b_pad), jnp.float32),
        grid=(nb,),
        in_specs=[
            pl.BlockSpec((tb, D), lambda i: (i, 0)),              # x streams per tile
            resident((D, H)),                                     # w1 (BN-folded)
            resident((2, H)),                                     # packed biases b1', b2'
            resident((H, H)),                                     # w2 (BN-folded)
            resident((1, H)),                                     # w3^T
            pl.BlockSpec(memory_space=pltpu.MemorySpace.SMEM),    # b3 scalar
        ],
        out_specs=pl.BlockSpec((1, tb), lambda i: (0, i)),        # lane-dense output
        compiler_params=pltpu.CompilerParams(
            dimension_semantics=("parallel",),
            vmem_limit_bytes=vmem_limit,
        ),
    )(x, w1f, bpack, w2f, w3t, b3)

    return out[0, :B].reshape(B, 1)


# --------------------------------------------------------------------------
# Synthetic parameters + pure-JAX reference
# --------------------------------------------------------------------------
def init_params(key, input_size):
    """Synthetic parameters matching TwoNNRegressor._build_network shapes
    (hidden_size = 2 * input_size, Linear biases zero-init, BN eval stats)."""
    H = 2 * input_size
    ks = jax.random.split(key, 8)

    def kaiming_uniform(k, fan_in, shape):
        bound = jnp.sqrt(6.0 / fan_in)
        return jax.random.uniform(k, shape, jnp.float32, -bound, bound)

    return {
        # Linear weights stored as [in, out] (transpose of PyTorch layout).
        "w1": kaiming_uniform(ks[0], input_size, (input_size, H)),
        "b1": jnp.zeros((1, H), jnp.float32),
        "w2": kaiming_uniform(ks[1], H, (H, H)),
        "b2": jnp.zeros((1, H), jnp.float32),
        "w3": kaiming_uniform(ks[2], H, (H, 1)),
        "b3": jnp.zeros((1, 1), jnp.float32),
        # BatchNorm1d affine params + running stats (eval mode).
        "g1": 1.0 + 0.1 * jax.random.normal(ks[3], (1, H), jnp.float32),
        "be1": 0.1 * jax.random.normal(ks[4], (1, H), jnp.float32),
        "m1": 0.05 * jax.random.normal(ks[5], (1, H), jnp.float32),
        "v1": jnp.abs(1.0 + 0.1 * jax.random.normal(ks[6], (1, H), jnp.float32)),
        "g2": jnp.ones((1, H), jnp.float32),
        "be2": jnp.zeros((1, H), jnp.float32),
        "m2": jnp.zeros((1, H), jnp.float32),
        "v2": jnp.ones((1, H), jnp.float32),
    }


def reference_forward(x, p):
    """Un-folded reference matching PyTorch eval-mode semantics."""
    h1 = x @ p["w1"] + p["b1"]
    h1 = (h1 - p["m1"]) / jnp.sqrt(p["v1"] + BN_EPS) * p["g1"] + p["be1"]
    h1 = jnp.maximum(h1, 0.0)
    h2 = h1 @ p["w2"] + p["b2"]
    h2 = (h2 - p["m2"]) / jnp.sqrt(p["v2"] + BN_EPS) * p["g2"] + p["be2"]
    h2 = jnp.maximum(h2, 0.0)
    return h2 @ p["w3"] + p["b3"]


# TODO(synk): training loop (fit / SGD-Adam / MSELoss / early stopping) and
# train-mode BatchNorm statistics are not implemented; this kernel covers the
# eval-mode forward pass only.

if __name__ == "__main__":
    key = jax.random.PRNGKey(0)
    k_x, k_x2, k_p = jax.random.split(key, 3)

    # Small shape consistent with the module: batch=8, input_size=16 -> hidden=32.
    B, D = 8, 16
    x = jax.random.normal(k_x, (B, D), jnp.float32)
    params = init_params(k_p, D)

    out = jax.block_until_ready(twonn_forward(x, params))
    ref = reference_forward(x, params)
    assert out.shape == (B, 1), out.shape
    assert jnp.allclose(out, ref, atol=2e-4, rtol=2e-4), (
        f"max abs err: {jnp.max(jnp.abs(out - ref))}"
    )

    # Second check: multi-tile grid (3 steps of 128 rows) + batch-padding path.
    B2 = 300
    x2 = jax.random.normal(k_x2, (B2, D), jnp.float32)
    out2 = jax.block_until_ready(twonn_forward(x2, params, max_rows_per_step=128))
    ref2 = reference_forward(x2, params)
    assert out2.shape == (B2, 1), out2.shape
    assert jnp.allclose(out2, ref2, atol=2e-4, rtol=2e-4), (
        f"max abs err: {jnp.max(jnp.abs(out2 - ref2))}"
    )

    print("KERNEL_OK")
</pallas_src>

<mosaic_0001>
module attributes {stable_mosaic.version = 11 : i64} {
  func.func @_twonn_kernel(%arg0: i32, %arg1: memref<128x16xf32, #tpu.memory_space<vmem>>, %arg2: memref<16x32xf32, #tpu.memory_space<vmem>>, %arg3: memref<2x32xf32, #tpu.memory_space<vmem>>, %arg4: memref<32x32xf32, #tpu.memory_space<vmem>>, %arg5: memref<1x32xf32, #tpu.memory_space<vmem>>, %arg6: memref<1xf32, #tpu.memory_space<smem>>, %arg7: memref<1x128xf32, #tpu.memory_space<vmem>>) attributes {dimension_semantics = [#tpu.dimension_semantics<parallel>], iteration_bounds = array<i64: 1>, scalar_prefetch = 0 : i64, scratch_operands = 0 : i64, tpu.core_type = #tpu.core_type<tc>, window_params = [{transform_indices = @transform_0, window_bounds = array<i64: 128, 16>}, {pipeline_mode = #tpu.pipeline_mode<synchronous>, transform_indices = @transform_1, window_bounds = array<i64: 16, 32>}, {pipeline_mode = #tpu.pipeline_mode<synchronous>, transform_indices = @transform_2, window_bounds = array<i64: 2, 32>}, {pipeline_mode = #tpu.pipeline_mode<synchronous>, transform_indices = @transform_3, window_bounds = array<i64: 32, 32>}, {pipeline_mode = #tpu.pipeline_mode<synchronous>, transform_indices = @transform_4, window_bounds = array<i64: 1, 32>}, {transform_indices = @transform_5, window_bounds = array<i64: 1>}, {transform_indices = @transform_6, window_bounds = array<i64: 1, 128>}]} {
    %c0 = arith.constant 0 : index
    %c0_0 = arith.constant 0 : index
    %0 = vector.load %arg1[%c0, %c0_0] : memref<128x16xf32, #tpu.memory_space<vmem>>, vector<128x16xf32>
    %c0_1 = arith.constant 0 : index
    %c0_2 = arith.constant 0 : index
    %1 = vector.load %arg3[%c0_1, %c0_2] : memref<2x32xf32, #tpu.memory_space<vmem>>, vector<1x32xf32>
    %c1 = arith.constant 1 : index
    %c0_3 = arith.constant 0 : index
    %2 = vector.load %arg3[%c1, %c0_3] : memref<2x32xf32, #tpu.memory_space<vmem>>, vector<1x32xf32>
    %c0_4 = arith.constant 0 : index
    %c0_5 = arith.constant 0 : index
    %3 = vector.load %arg2[%c0_4, %c0_5] : memref<16x32xf32, #tpu.memory_space<vmem>>, vector<16x32xf32>
    %cst = arith.constant dense<0.000000e+00> : vector<128x32xf32>
    %4 = tpu.matmul %0, %3, %cst {dimension_numbers = #tpu.dot_dimension_numbers<[1], [0], [0], [1], [0, 0, 1, 1], [], []>} : vector<128x16xf32>, vector<16x32xf32>, vector<128x32xf32> -> vector<128x32xf32>
    %5 = vector.broadcast %1 : vector<1x32xf32> to vector<128x32xf32>
    %6 = arith.addf %4, %5 : vector<128x32xf32>
    %cst_6 = arith.constant 0.000000e+00 : f32
    %7 = vector.broadcast %cst_6 : f32 to vector<128x32xf32>
    %8 = arith.maximumf %6, %7 : vector<128x32xf32>
    %c0_7 = arith.constant 0 : index
    %c0_8 = arith.constant 0 : index
    %9 = vector.load %arg4[%c0_7, %c0_8] : memref<32x32xf32, #tpu.memory_space<vmem>>, vector<32x32xf32>
    %cst_9 = arith.constant dense<0.000000e+00> : vector<128x32xf32>
    %10 = tpu.matmul %8, %9, %cst_9 {dimension_numbers = #tpu.dot_dimension_numbers<[1], [0], [0], [1], [0, 0, 1, 1], [], []>} : vector<128x32xf32>, vector<32x32xf32>, vector<128x32xf32> -> vector<128x32xf32>
    %11 = vector.broadcast %2 : vector<1x32xf32> to vector<128x32xf32>
    %12 = arith.addf %10, %11 : vector<128x32xf32>
    %cst_10 = arith.constant 0.000000e+00 : f32
    %13 = vector.broadcast %cst_10 : f32 to vector<128x32xf32>
    %14 = arith.maximumf %12, %13 : vector<128x32xf32>
    %c0_11 = arith.constant 0 : index
    %c0_12 = arith.constant 0 : index
    %15 = vector.load %arg5[%c0_11, %c0_12] : memref<1x32xf32, #tpu.memory_space<vmem>>, vector<1x32xf32>
    %16 = vector.broadcast %15 : vector<1x32xf32> to vector<128x32xf32>
    %17 = arith.mulf %14, %16 : vector<128x32xf32>
    %cst_13 = arith.constant dense<0.000000e+00> : vector<128xf32>
    %18 = vector.multi_reduction <add>, %17, %cst_13 [1] : vector<128x32xf32> to vector<128xf32>
    %c0_14 = arith.constant 0 : index
    %19 = memref.load %arg6[%c0_14] : memref<1xf32, #tpu.memory_space<smem>>
    %20 = vector.broadcast %19 : f32 to vector<128xf32>
    %21 = arith.addf %18, %20 : vector<128xf32>
    %22 = vector.shape_cast %21 : vector<128xf32> to vector<1x128xf32>
    %c0_15 = arith.constant 0 : index
    %c0_16 = arith.constant 0 : index
    %23 = vector.load %arg7[%c0_15, %c0_16] : memref<1x128xf32, #tpu.memory_space<vmem>>, vector<1x128xf32>
    tpu.vector_store %arg7[%c0_15, %c0_16], %22 {strides = array<i32>} : memref<1x128xf32, #tpu.memory_space<vmem>>, vector<1x128xf32>,
    return
  }
  func.func @transform_0(%arg0: i32) -> (i32, i32) {
    %c0_i32 = arith.constant 0 : i32
    %c0_i32_0 = arith.constant 0 : i32
    return %arg0, %c0_i32 : i32, i32
  }
  func.func @transform_1(%arg0: i32) -> (i32, i32) {
    %c0_i32 = arith.constant 0 : i32
    %c0_i32_0 = arith.constant 0 : i32
    %c0_i32_1 = arith.constant 0 : i32
    return %c0_i32, %c0_i32_0 : i32, i32
  }
  func.func @transform_2(%arg0: i32) -> (i32, i32) {
    %c0_i32 = arith.constant 0 : i32
    %c0_i32_0 = arith.constant 0 : i32
    %c0_i32_1 = arith.constant 0 : i32
    return %c0_i32, %c0_i32_0 : i32, i32
  }
  func.func @transform_3(%arg0: i32) -> (i32, i32) {
    %c0_i32 = arith.constant 0 : i32
    %c0_i32_0 = arith.constant 0 : i32
    %c0_i32_1 = arith.constant 0 : i32
    return %c0_i32, %c0_i32_0 : i32, i32
  }
  func.func @transform_4(%arg0: i32) -> (i32, i32) {
    %c0_i32 = arith.constant 0 : i32
    %c0_i32_0 = arith.constant 0 : i32
    %c0_i32_1 = arith.constant 0 : i32
    return %c0_i32, %c0_i32_0 : i32, i32
  }
  func.func @transform_5(%arg0: i32) -> i32 {
    %c0_i32 = arith.constant 0 : i32
    %c0_i32_0 = arith.constant 0 : i32
    return %c0_i32 : i32
  }
  func.func @transform_6(%arg0: i32) -> (i32, i32) {
    %c0_i32 = arith.constant 0 : i32
    %c0_i32_0 = arith.constant 0 : i32
    return %c0_i32, %arg0 : i32, i32
  }
}

</mosaic_0001>

<bundles_post_ra>
// kernel: tpu_custom_call.1
= control target key start
LH: loop header
LB: loop body
LE: loop exit
PB: predicated region body
PF: predicated region fallthrough
CT: control target
= control target key end

     0   :  { %vm46_vm0 = vcmask 130048   ;;  %s824_s0 = inlined_call_operand.vmem [shape: f32[128,16], index: 0, kind: input, shape index: {}]   ;;  %s825_s1 = inlined_call_operand.vmem [shape: f32[16,32], index: 1, kind: input, shape index: {}]   ;;  %s826_s2 = inlined_call_operand.vmem [shape: f32[2,32], index: 2, kind: input, shape index: {}]   ;;  %s827_s3 = inlined_call_operand.vmem [shape: f32[32,32], index: 3, kind: input, shape index: {}]   ;;  %s828_s4 = inlined_call_operand.vmem [shape: f32[1,32], index: 4, kind: input, shape index: {}]   ;;  %s829_s5 = inlined_call_operand.<no memory space> [shape: f32[1], index: 5, kind: input, shape index: {}]   ;;  %s830_s6 = inlined_call_operand.hbm [shape: f32[1,128], index: 6, kind: output, shape index: {}]  }
   0x1   :  { %v44_v0 = vld [vmem:[%s825_s1 + $0x8] sm:$0xff]  ;;  %v43_v1 = vld [vmem:[%s825_s1] sm:$0xff] }
   0x2   :  { %109 = vmatpush.msra.mxu0 %v44_v0  ;;  %v25_v2 = vld [vmem:[%s824_s0] sm:$0xff]  ;;  %526 = vmatpush.msra.mxu3 %v44_v0 }
   0x4   :  { %110 = vmatpush.msra.mxu0 %v43_v1  ;;  %527 = vmatpush.msra.mxu3 %v43_v1 }
   0x5   :  { %12 = vsyncpa [#allocation4], 0  ;;  %494 = vmatmul.msk.f32.vlgmr.msra.gmra.mxu0 %vm46_vm0, %v25_v2  ;;  %v26_v3 = vld [vmem:[%s824_s0 + $0x8] sm:$0xff]  ;;  %v27_v4 = vld [vmem:[%s824_s0 + $0x10] sm:$0xff]  ;;  %vm181_vm1 = vcmask 261120   ;;  %vm418_vm2 = vcmask 130112  }
   0x6   :  { %v28_v5 = vld [vmem:[%s824_s0 + $0x18] sm:$0xff]  ;;  %v29_v6 = vld [vmem:[%s824_s0 + $0x20] sm:$0xff]  ;;  %v34_v7 = vld [vmem:[%s824_s0 + $0x48] sm:$0xff]  ;;  %vm422_vm3 = vcmask 195712   ;;  %vm426_vm4 = vcmask 261312   ;;  %vm430_vm5 = vcmask 326912  }
   0x7   :  { %503 = vmatmul.msk.f32.vlgmr.msra.gmra.mxu3 %vm46_vm0, %v34_v7  ;;  %v30_v8 = vld [vmem:[%s824_s0 + $0x28] sm:$0xff]  ;;  %v35_v9 = vld [vmem:[%s824_s0 + $0x50] sm:$0xff]  ;;  %v36_v11 = vld [vmem:[%s824_s0 + $0x58] sm:$0xff]  ;;  %vm434_vm6 = vcmask 392512   ;;  %vm438_vm7 = vcmask 458112   ;;  %vm442_vm8 = vcmask 523712  }
   0x8   :  { %v31_v10 = vld [vmem:[%s824_s0 + $0x30] sm:$0xff]  ;;  %v179_v12 = vld [vmem:[%s827_s3 + $0x18] sm:$0xff]  ;;  %v37_v14 = vld [vmem:[%s824_s0 + $0x60] sm:$0xff]  ;;  %vm446_vm9 = vcmask 589312   ;;  %vm450_vm10 = vcmask 654912   ;;  %vm454_vm11 = vcmask 720512  }
   0x9   :  { %242 = vmatpush.msra.mxu1 %v179_v12  ;;  %528 = vmatpush.msra.mxu2 %v179_v12  ;;  %v32_v13 = vld [vmem:[%s824_s0 + $0x38] sm:$0xff]  ;;  %v33_v15 = vld [vmem:[%s824_s0 + $0x40] sm:$0xff]  ;;  %v38_v16 = vld [vmem:[%s824_s0 + $0x68] sm:$0xff]  ;;  %vm458_vm12 = vcmask 786112   ;;  %vm462_vm13 = vcmask 851712   ;;  %vm466_vm14 = vcmask 917312  }
   0xa   :  { %v39_v17 = vld [vmem:[%s824_s0 + $0x70] sm:$0xff]  ;;  %v40_v18 = vld [vmem:[%s824_s0 + $0x78] sm:$0xff]  ;;  %v177_v20 = vld [vmem:[%s827_s3 + $0x8] sm:$0xff]  ;;  %vm470_vm15 = vcmask 982912   ;;  %s485_s22 = sshll.u32 %s830_s6, 4  ;;  %s486_s22 = int_to_ptr.hbm [resolvable:$true] %s485_s22 }
   0xb   :  { %v178_v19 = vld [vmem:[%s827_s3 + $0x10] sm:$0xff]  ;;  %v176_v21 = vld [vmem:[%s827_s3] sm:$0xff] }
   0xc   :  { %243 = vmatpush.msra.mxu1 %v178_v19  ;;  %529 = vmatpush.msra.mxu2 %v178_v19  ;;  %v683_v22 = vld [vmem:[%s826_s2] ss:$0 sm:$0xff]  ;;  %v720_v7 = vld [vmem:[%s826_s2 + $0x1] ss:$0 sm:$0xff] }
   0xd   :  { %495 = vmatmul.msk.f32.gmra.mxu0 %vm46_vm0, %v26_v3 }
   0xe   :  { %244 = vmatpush.msra.mxu1 %v177_v20  ;;  %530 = vmatpush.msra.mxu2 %v177_v20 }
   0xf   :  { %504 = vmatmul.msk.f32.gmra.mxu3 %vm46_vm0, %v35_v9 }
  0x10   :  { %245 = vmatpush.msra.mxu1 %v176_v21  ;;  %531 = vmatpush.msra.mxu2 %v176_v21 }
  0x15   :  { %496 = vmatmul.msk.f32.gmra.mxu0 %vm46_vm0, %v27_v4 }
  0x17   :  { %505 = vmatmul.msk.f32.gmra.mxu3 %vm46_vm0, %v36_v11 }
  0x1d   :  { %497 = vmatmul.msk.f32.gmra.mxu0 %vm46_vm0, %v28_v5 }
  0x1f   :  { %506 = vmatmul.msk.f32.gmra.mxu3 %vm46_vm0, %v37_v14 }
  0x25   :  { %498 = vmatmul.msk.f32.gmra.mxu0 %vm46_vm0, %v29_v6 }
  0x27   :  { %507 = vmatmul.msk.f32.gmra.mxu3 %vm46_vm0, %v38_v16 }
  0x2d   :  { %499 = vmatmul.msk.f32.gmra.mxu0 %vm46_vm0, %v30_v8 }
  0x2f   :  { %508 = vmatmul.msk.f32.gmra.mxu3 %vm46_vm0, %v39_v17 }
  0x35   :  { %500 = vmatmul.msk.f32.gmra.mxu0 %vm46_vm0, %v31_v10  ;;  %v726_v10 = vld [vmem:[%s828_s4] ss:$0 sm:$0xff] }
  0x37   :  { %509 = vmatmul.msk.f32.gmra.mxu3 %vm46_vm0, %v40_v18 }
  0x3d   :  { %501 = vmatmul.msk.f32.gmra.mxu0 %vm46_vm0, %v32_v13 }
  0x45   :  { %502 = vmatmul.msk.f32.gmra.mxu0 %vm46_vm0, %v33_v15  ;;  %vm474_vm0 = vcmask 1048512  }
  0x82   :  { %v112_v23 = vpop.f32.mrf.mxu0 }
  0x83   :  { %v113_v24 = vadd.f32 %v683_v22, %v112_v23 }
  0x85   :  { %v160_v25 = vmax.f32 %v113_v24, 0.0 }
  0x87   :  { %510 = vmatmul.msk.f32.vlgmr.msra.gmra.mxu1 %vm181_vm1, %v160_v25 }
  0x8a   :  { %v115_v26 = vpop.f32.mrf.mxu0  ;;  %v139_v44 = vpop.f32.mrf.mxu3 }
  0x8b   :  { %v116_v27 = vadd.f32 %v683_v22, %v115_v26  ;;  %v140_v52 = vadd.f32 %v683_v22, %v139_v44 }
  0x8d   :  { %v161_v28 = vmax.f32 %v116_v27, 0.0  ;;  %v169_v53 = vmax.f32 %v140_v52, 0.0 }
  0x8f   :  { %511 = vmatmul.msk.f32.gmra.mxu1 %vm181_vm1, %v161_v28 }
  0x92   :  { %v118_v29 = vpop.f32.mrf.mxu0  ;;  %v142_v49 = vpop.f32.mrf.mxu3 }
  0x93   :  { %v119_v30 = vadd.f32 %v683_v22, %v118_v29  ;;  %v143_v55 = vadd.f32 %v683_v22, %v142_v49 }
  0x95   :  { %v162_v31 = vmax.f32 %v119_v30, 0.0  ;;  %v170_v56 = vmax.f32 %v143_v55, 0.0 }
  0x97   :  { %512 = vmatmul.msk.f32.gmra.mxu1 %vm181_vm1, %v162_v31 }
  0x9a   :  { %v121_v32 = vpop.f32.mrf.mxu0  ;;  %v145_v54 = vpop.f32.mrf.mxu3 }
  0x9b   :  { %v122_v33 = vadd.f32 %v683_v22, %v121_v32  ;;  %v146_v58 = vadd.f32 %v683_v22, %v145_v54 }
  0x9d   :  { %v163_v34 = vmax.f32 %v122_v33, 0.0  ;;  %v171_v59 = vmax.f32 %v146_v58, 0.0 }
  0x9f   :  { %513 = vmatmul.msk.f32.gmra.mxu1 %vm181_vm1, %v163_v34 }
  0xa2   :  { %v124_v35 = vpop.f32.mrf.mxu0  ;;  %v148_v57 = vpop.f32.mrf.mxu3 }
  0xa3   :  { %v125_v36 = vadd.f32 %v683_v22, %v124_v35  ;;  %v149_v60 = vadd.f32 %v683_v22, %v148_v57 }
  0xa5   :  { %v164_v37 = vmax.f32 %v125_v36, 0.0  ;;  %v172_v62 = vmax.f32 %v149_v60, 0.0 }
  0xa7   :  { %514 = vmatmul.msk.f32.gmra.mxu1 %vm181_vm1, %v164_v37 }
  0xaa   :  { %v127_v38 = vpop.f32.mrf.mxu0  ;;  %v151_v61 = vpop.f32.mrf.mxu3 }
  0xab   :  { %v128_v39 = vadd.f32 %v683_v22, %v127_v38  ;;  %v152_v63 = vadd.f32 %v683_v22, %v151_v61 }
  0xad   :  { %v165_v40 = vmax.f32 %v128_v39, 0.0  ;;  %v173_v1 = vmax.f32 %v152_v63, 0.0 }
  0xaf   :  { %515 = vmatmul.msk.f32.gmra.mxu1 %vm181_vm1, %v165_v40 }
  0xb2   :  { %v130_v41 = vpop.f32.mrf.mxu0  ;;  %v154_v0 = vpop.f32.mrf.mxu3 }
  0xb3   :  { %v131_v42 = vadd.f32 %v683_v22, %v130_v41  ;;  %v155_v2 = vadd.f32 %v683_v22, %v154_v0 }
  0xb5   :  { %v166_v43 = vmax.f32 %v131_v42, 0.0  ;;  %v174_v3 = vmax.f32 %v155_v2, 0.0 }
  0xb7   :  { %516 = vmatmul.msk.f32.gmra.mxu1 %vm181_vm1, %v166_v43 }
  0xba   :  { %v133_v45 = vpop.f32.mrf.mxu0  ;;  %v157_v4 = vpop.f32.mrf.mxu3 }
  0xbb   :  { %v134_v46 = vadd.f32 %v683_v22, %v133_v45  ;;  %v158_v5 = vadd.f32 %v683_v22, %v157_v4 }
  0xbd   :  { %v167_v47 = vmax.f32 %v134_v46, 0.0  ;;  %v175_v6 = vmax.f32 %v158_v5, 0.0 }
  0xbf   :  { %517 = vmatmul.msk.f32.gmra.mxu1 %vm181_vm1, %v167_v47 }
  0xc2   :  { %v136_v48 = vpop.f32.mrf.mxu0 }
  0xc3   :  { %v137_v50 = vadd.f32 %v683_v22, %v136_v48 }
  0xc5   :  { %v168_v51 = vmax.f32 %v137_v50, 0.0 }
  0xc7   :  { %518 = vmatmul.msk.f32.vlgmr.msra.gmra.mxu2 %vm181_vm1, %v168_v51 }
  0xcf   :  { %519 = vmatmul.msk.f32.gmra.mxu2 %vm181_vm1, %v169_v53 }
  0xd7   :  { %520 = vmatmul.msk.f32.gmra.mxu2 %vm181_vm1, %v170_v56 }
  0xdf   :  { %521 = vmatmul.msk.f32.gmra.mxu2 %vm181_vm1, %v171_v59 }
  0xe7   :  { %522 = vmatmul.msk.f32.gmra.mxu2 %vm181_vm1, %v172_v62 }
  0xef   :  { %523 = vmatmul.msk.f32.gmra.mxu2 %vm181_vm1, %v173_v1 }
  0xf7   :  { %524 = vmatmul.msk.f32.gmra.mxu2 %vm181_vm1, %v174_v3 }
  0xff   :  { %525 = vmatmul.msk.f32.gmra.mxu2 %vm181_vm1, %v175_v6 }
 0x104   :  { %v247_v8 = vpop.f32.mrf.mxu1 }
 0x105   :  { %v248_v9 = vadd.f32 %v720_v7, %v247_v8 }
 0x107   :  { %v295_v11 = vmax.f32 %v248_v9, 0.0 }
 0x109   :  { %v315_v12 = vmul.f32 %v726_v10, %v295_v11 }
 0x10b   :  { %v331_v13 = vsel %vm181_vm1, %v315_v12, 0.0 }
 0x10c   :  { %v250_v14 = vpop.f32.mrf.mxu1  ;;  %332 = vadd.xlane.f32.xlu0 %v331_v13 }
 0x10d   :  { %v251_v15 = vadd.f32 %v720_v7, %v250_v14 }
 0x10f   :  { %v296_v16 = vmax.f32 %v251_v15, 0.0 }
 0x111   :  { %v316_v17 = vmul.f32 %v726_v10, %v296_v16 }
 0x113   :  { %v334_v18 = vsel %vm181_vm1, %v316_v17, 0.0 }
 0x114   :  { %v253_v19 = vpop.f32.mrf.mxu1  ;;  %335 = vadd.xlane.f32.xlu0 %v334_v18 }
 0x115   :  { %v254_v20 = vadd.f32 %v720_v7, %v253_v19 }
 0x117   :  { %v297_v21 = vmax.f32 %v254_v20, 0.0 }
 0x119   :  { %v317_v22 = vmul.f32 %v726_v10, %v297_v21 }
 0x11b   :  { %v337_v23 = vsel %vm181_vm1, %v317_v22, 0.0 }
 0x11c   :  { %v256_v24 = vpop.f32.mrf.mxu1  ;;  %338 = vadd.xlane.f32.xlu1 %v337_v23 }
 0x11d   :  { %v257_v25 = vadd.f32 %v720_v7, %v256_v24 }
 0x11f   :  { %v298_v26 = vmax.f32 %v257_v25, 0.0 }
 0x121   :  { %v318_v27 = vmul.f32 %v726_v10, %v298_v26 }
 0x123   :  { %v340_v28 = vsel %vm181_vm1, %v318_v27, 0.0 }
 0x124   :  { %v259_v29 = vpop.f32.mrf.mxu1  ;;  %341 = vadd.xlane.f32.xlu1 %v340_v28 }
 0x125   :  { %v260_v30 = vadd.f32 %v720_v7, %v259_v29 }
 0x127   :  { %v299_v31 = vmax.f32 %v260_v30, 0.0 }
 0x129   :  { %v319_v32 = vmul.f32 %v726_v10, %v299_v31 }
 0x12b   :  { %v343_v33 = vsel %vm181_vm1, %v319_v32, 0.0 }
 0x12c   :  { %v262_v34 = vpop.f32.mrf.mxu1  ;;  %344 = vadd.xlane.f32.xlu2 %v343_v33  ;;  %v413_v33 = vlaneseq }
 0x12d   :  { %v263_v35 = vadd.f32 %v720_v7, %v262_v34 }
 0x12f   :  { %v300_v36 = vmax.f32 %v263_v35, 0.0 }
 0x131   :  { %v320_v37 = vmul.f32 %v726_v10, %v300_v36 }
 0x133   :  { %v346_v38 = vsel %vm181_vm1, %v320_v37, 0.0  ;;  %v775_v37 = vand.u32 127, %v413_v33 }
 0x134   :  { %v265_v39 = vpop.f32.mrf.mxu1  ;;  %347 = vadd.xlane.f32.xlu2 %v346_v38 }
 0x135   :  { %v266_v40 = vadd.f32 %v720_v7, %v265_v39  ;;  %v472_v33 = vadd.s32 4294967176, %v775_v37 }
 0x137   :  { %v301_v41 = vmax.f32 %v266_v40, 0.0  ;;  %v420_v40 = vadd.s32 4294967280, %v775_v37 }
 0x139   :  { %v321_v42 = vmul.f32 %v726_v10, %v301_v41 }
 0x13b   :  { %v349_v43 = vsel %vm181_vm1, %v321_v42, 0.0  ;;  %v424_v42 = vadd.s32 4294967272, %v775_v37 }
 0x13c   :  { %v268_v44 = vpop.f32.mrf.mxu1  ;;  %350 = vadd.xlane.f32.xlu0 %v349_v43 }
 0x13d   :  { %v269_v45 = vadd.f32 %v720_v7, %v268_v44 }
 0x13f   :  { %v302_v46 = vmax.f32 %v269_v45, 0.0 }
 0x141   :  { %v322_v47 = vmul.f32 %v726_v10, %v302_v46 }
 0x143   :  { %v352_v48 = vsel %vm181_vm1, %v322_v47, 0.0  ;;  %v428_v47 = vadd.s32 4294967264, %v775_v37 }
 0x144   :  { %353 = vadd.xlane.f32.xlu1 %v352_v48 }
 0x14a   :  { %v271_v49 = vpop.f32.mrf.mxu2 }
 0x14b   :  { %v272_v50 = vadd.f32 %v720_v7, %v271_v49 }
 0x14d   :  { %v303_v51 = vmax.f32 %v272_v50, 0.0 }
 0x14f   :  { %v323_v52 = vmul.f32 %v726_v10, %v303_v51 }
 0x151   :  { %v355_v53 = vsel %vm181_vm1, %v323_v52, 0.0 }
 0x152   :  { %v274_v54 = vpop.f32.mrf.mxu2  ;;  %356 = vadd.xlane.f32.xlu2 %v355_v53  ;;  %v432_v53 = vadd.s32 4294967256, %v775_v37 }
 0x153   :  { %v275_v55 = vadd.f32 %v720_v7, %v274_v54 }
 0x155   :  { %v304_v56 = vmax.f32 %v275_v55, 0.0 }
 0x157   :  { %v324_v57 = vmul.f32 %v726_v10, %v304_v56  ;;  %v436_v56 = vadd.s32 4294967248, %v775_v37 }
 0x159   :  { %v358_v58 = vsel %vm181_vm1, %v324_v57, 0.0 }
 0x15a   :  { %v277_v59 = vpop.f32.mrf.mxu2  ;;  %359 = vadd.xlane.f32.xlu0 %v358_v58 }
 0x15b   :  { %v278_v60 = vadd.f32 %v720_v7, %v277_v59  ;;  %v440_v59 = vadd.s32 4294967240, %v775_v37 }
 0x15d   :  { %v305_v61 = vmax.f32 %v278_v60, 0.0 }
 0x15f   :  { %v325_v62 = vmul.f32 %v726_v10, %v305_v61 }
 0x161   :  { %v361_v63 = vsel %vm181_vm1, %v325_v62, 0.0  ;;  %v444_v62 = vadd.s32 4294967232, %v775_v37 }
 0x162   :  { %v280_v0 = vpop.f32.mrf.mxu2  ;;  %362 = vadd.xlane.f32.xlu1 %v361_v63 }
 0x163   :  { %v281_v1 = vadd.f32 %v720_v7, %v280_v0 }
 0x165   :  { %v306_v2 = vmax.f32 %v281_v1, 0.0 }
 0x167   :  { %v326_v3 = vmul.f32 %v726_v10, %v306_v2  ;;  %v448_v2 = vadd.s32 4294967224, %v775_v37 }
 0x169   :  { %v364_v4 = vsel %vm181_vm1, %v326_v3, 0.0 }
 0x16a   :  { %v283_v5 = vpop.f32.mrf.mxu2  ;;  %365 = vadd.xlane.f32.xlu2 %v364_v4 }
 0x16b   :  { %v284_v6 = vadd.f32 %v720_v7, %v283_v5 }
 0x16d   :  { %v307_v8 = vmax.f32 %v284_v6, 0.0  ;;  %v452_v6 = vadd.s32 4294967216, %v775_v37 }
 0x16f   :  { %v327_v9 = vmul.f32 %v726_v10, %v307_v8 }
 0x171   :  { %v367_v11 = vsel %vm181_vm1, %v327_v9, 0.0 }
 0x172   :  { %v286_v12 = vpop.f32.mrf.mxu2  ;;  %368 = vadd.xlane.f32.xlu0 %v367_v11 }
 0x173   :  { %v287_v13 = vadd.f32 %v720_v7, %v286_v12 }
 0x175   :  { %v308_v14 = vmax.f32 %v287_v13, 0.0  ;;  %v456_v13 = vadd.s32 4294967208, %v775_v37 }
 0x177   :  { %v328_v15 = vmul.f32 %v726_v10, %v308_v14 }
 0x179   :  { %v370_v16 = vsel %vm181_vm1, %v328_v15, 0.0 }
 0x17a   :  { %v289_v17 = vpop.f32.mrf.mxu2  ;;  %371 = vadd.xlane.f32.xlu1 %v370_v16 }
 0x17b   :  { %v290_v18 = vadd.f32 %v720_v7, %v289_v17  ;;  %v460_v17 = vadd.s32 4294967200, %v775_v37 }
 0x17d   :  { %v309_v19 = vmax.f32 %v290_v18, 0.0 }
 0x17f   :  { %v329_v20 = vmul.f32 %v726_v10, %v309_v19  ;;  %v333_v27 = vpop.xlane.xlu0 %332 }
 0x181   :  { %v373_v21 = vsel %vm181_vm1, %v329_v20, 0.0 }
 0x182   :  { %v292_v22 = vpop.f32.mrf.mxu2  ;;  %374 = vadd.xlane.f32.xlu2 %v373_v21  ;;  %v464_v21 = vadd.s32 4294967192, %v775_v37 }
 0x183   :  { %v293_v23 = vadd.f32 %v720_v7, %v292_v22  ;;  %v780_v7 = vstv %s829_s5  ;;  %s562_s5 = smov [#allocation3]  }
 0x184   :  { %v381_v39 = vadd.f32 %v780_v7, %v333_v27  ;;  %s483_s19 = sshll.u32 %s562_s5, 4  ;;  %s484_s19 = int_to_ptr.vmem [resolvable:$true] %s483_s19 }
 0x185   :  { %v310_v24 = vmax.f32 %v293_v23, 0.0 }
 0x186   :  { %v415_v50 = vperm.slane %v381_v39, %v775_v37 }
 0x187   :  { %v330_v25 = vmul.f32 %v726_v10, %v310_v24  ;;  %v336_v30 = vpop.xlane.xlu0 %335  ;;  %v416_v10 = vadd.s32 4294967288, %v775_v37 }
 0x188   :  { %v382_v38 = vadd.f32 %v780_v7, %v336_v30 }
 0x189   :  { %v376_v26 = vsel %vm181_vm1, %v330_v25, 0.0  ;;  %v468_v25 = vadd.s32 4294967184, %v775_v37 }
 0x18a   :  { %377 = vadd.xlane.f32.xlu0 %v376_v26  ;;  %v417_v45 = vperm.slane %v382_v38, %v416_v10 }
 0x18c   :  { %v419_v55 = vsel %vm418_vm2, %v417_v45, %v415_v50 }
 0x18f   :  { %v339_v28 = vpop.xlane.xlu1 %338 }
 0x190   :  { %v383_v41 = vadd.f32 %v780_v7, %v339_v28 }
 0x192   :  { %v421_v51 = vperm.slane %v383_v41, %v420_v40 }
 0x194   :  { %v423_v61 = vsel %vm422_vm3, %v421_v51, %v419_v55 }
 0x197   :  { %v342_v31 = vpop.xlane.xlu1 %341 }
 0x198   :  { %v384_v43 = vadd.f32 %v780_v7, %v342_v31 }
 0x19a   :  { %v425_v52 = vperm.slane %v384_v43, %v424_v42 }
 0x19c   :  { %v427_v0 = vsel %vm426_vm4, %v425_v52, %v423_v61 }
 0x19f   :  { %v345_v29 = vpop.xlane.xlu2 %344 }
 0x1a0   :  { %v385_v48 = vadd.f32 %v780_v7, %v345_v29 }
 0x1a2   :  { %v429_v58 = vperm.slane %v385_v48, %v428_v47 }
 0x1a4   :  { %v431_v11 = vsel %vm430_vm5, %v429_v58, %v427_v0 }
 0x1a7   :  { %v348_v32 = vpop.xlane.xlu2 %347 }
 0x1a8   :  { %v386_v54 = vadd.f32 %v780_v7, %v348_v32 }
 0x1aa   :  { %v433_v1 = vperm.slane %v386_v54, %v432_v53 }
 0x1ac   :  { %v435_v19 = vsel %vm434_vm6, %v433_v1, %v431_v11 }
 0x1af   :  { %v351_v34 = vpop.xlane.xlu0 %350 }
 0x1b0   :  { %v387_v57 = vadd.f32 %v780_v7, %v351_v34 }
 0x1b2   :  { %v437_v5 = vperm.slane %v387_v57, %v436_v56 }
 0x1b4   :  { %v439_v23 = vsel %vm438_vm7, %v437_v5, %v435_v19 }
 0x1b7   :  { %v354_v35 = vpop.xlane.xlu1 %353 }
 0x1b8   :  { %v388_v60 = vadd.f32 %v780_v7, %v354_v35 }
 0x1ba   :  { %v441_v12 = vperm.slane %v388_v60, %v440_v59 }
 0x1bc   :  { %v443_v27 = vsel %vm442_vm8, %v441_v12, %v439_v23 }
 0x1c5   :  { %v357_v36 = vpop.xlane.xlu2 %356 }
 0x1c6   :  { %v389_v63 = vadd.f32 %v780_v7, %v357_v36 }
 0x1c8   :  { %v445_v16 = vperm.slane %v389_v63, %v444_v62 }
 0x1ca   :  { %v447_v29 = vsel %vm446_vm9, %v445_v16, %v443_v27 }
 0x1cd   :  { %v360_v44 = vpop.xlane.xlu0 %359 }
 0x1ce   :  { %v390_v3 = vadd.f32 %v780_v7, %v360_v44 }
 0x1d0   :  { %v449_v20 = vperm.slane %v390_v3, %v448_v2 }
 0x1d2   :  { %v451_v31 = vsel %vm450_vm10, %v449_v20, %v447_v29 }
 0x1d5   :  { %v363_v46 = vpop.xlane.xlu1 %362 }
 0x1d6   :  { %v391_v8 = vadd.f32 %v780_v7, %v363_v46 }
 0x1d8   :  { %v453_v24 = vperm.slane %v391_v8, %v452_v6 }
 0x1da   :  { %v455_v34 = vsel %vm454_vm11, %v453_v24, %v451_v31 }
 0x1dd   :  { %v366_v49 = vpop.xlane.xlu2 %365 }
 0x1de   :  { %v392_v14 = vadd.f32 %v780_v7, %v366_v49 }
 0x1e0   :  { %v457_v28 = vperm.slane %v392_v14, %v456_v13 }
 0x1e2   :  { %v459_v10 = vsel %vm458_vm12, %v457_v28, %v455_v34 }
 0x1e5   :  { %v369_v4 = vpop.xlane.xlu0 %368 }
 0x1e6   :  { %v393_v18 = vadd.f32 %v780_v7, %v369_v4 }
 0x1e8   :  { %v461_v30 = vperm.slane %v393_v18, %v460_v17 }
 0x1ea   :  { %v463_v39 = vsel %vm462_vm13, %v461_v30, %v459_v10 }
 0x1ed   :  { %v372_v9 = vpop.xlane.xlu1 %371 }
 0x1ee   :  { %v394_v22 = vadd.f32 %v780_v7, %v372_v9 }
 0x1f0   :  { %v465_v32 = vperm.slane %v394_v22, %v464_v21 }
 0x1f2   :  { %v467_v40 = vsel %vm466_vm14, %v465_v32, %v463_v39 }
 0x1f5   :  { %v375_v15 = vpop.xlane.xlu2 %374 }
 0x1f6   :  { %v395_v26 = vadd.f32 %v780_v7, %v375_v15 }
 0x1f8   :  { %v469_v35 = vperm.slane %v395_v26, %v468_v25 }
 0x1fa   :  { %v471_v42 = vsel %vm470_vm15, %v469_v35, %v467_v40 }
 0x1fd   :  { %v378_v36 = vpop.xlane.xlu0 %377 }
 0x1fe   :  { %v396_v38 = vadd.f32 %v780_v7, %v378_v36 }
 0x200   :  { %v473_v41 = vperm.slane %v396_v38, %v472_v33 }
 0x202   :  { %v475_v37 = vsel %vm474_vm0, %v473_v41, %v471_v42 }
 0x203   :  { %477 = vst [vmem:[#allocation3] sm:$0x1] %v475_v37 }
 0x204   :  { %488 = dma.vmem_to_hbm [thread:$0]  %s484_s19, 16, %s486_s22, [#allocation4]  }
 0x205   :  { %560 = dma.done.wait [#allocation4], 16  }
 0x206   :  { %561 = vsyncadd [#allocation4], 4294967280 }
 0x207   :  { %493 = vsyncpa [#allocation4], 1 }

</bundles_post_ra>
